<compile_context>
chip_gen: v7x
topology: tpu7x:2x2x1
jax: 0.10.0
libtpu: 0.0.40
codegen_flags: <defaults>
</compile_context>

<pallas_src>
import jax
import jax.numpy as jnp
from jax.experimental import pallas as pl
from jax.experimental.pallas import tpu as pltpu


def _round_up(a, m):
    return (a + m - 1) // m * m


def make_cnn1d_kernel(Ks, Co, C, L, L_pad, seq_chunk):
    n_branches = len(Ks)
    k_max = max(Ks)

    def kernel(*refs):
        x_ref = refs[0]
        conv_refs = refs[1:1 + 2 * n_branches]
        fcw_ref = refs[1 + 2 * n_branches]
        fcb_ref = refs[2 + 2 * n_branches]
        out_ref = refs[3 + 2 * n_branches]
        feat_ref = refs[4 + 2 * n_branches]          # VMEM scratch (TN, n_branches*Co)

        x = x_ref[...]                               # (TN, L_pad) float32
        TN = x.shape[0]

        # k-shifted copies of the padded rows, shared by all branches.
        # pltpu.roll(x, L_pad - k) == left-shift by k (np.roll semantics), so
        # x_sh[k][:, t] == x[:, t + k] for t < L_pad - k; wrapped tail lanes are
        # masked away after ReLU below.
        x_sh = [x] + [pltpu.roll(x, shift=L_pad - k, axis=1) for k in range(1, k_max)]

        for i, K in enumerate(Ks):
            w = conv_refs[2 * i][...]                # (Co, K)
            b = conv_refs[2 * i + 1][...]            # (1, Co)
            Lout = L - K + 1

            # Hoist broadcast-shaped taps/bias out of the chunk loop.
            w_taps = [w[:, k:k + 1][None, :, :] for k in range(K)]   # (1, Co, 1)
            b3 = b[:, :, None]                                       # (1, Co, 1)

            run_max = jnp.zeros((TN, Co), jnp.float32)
            c0 = 0
            while c0 < Lout:                         # static Python loop over lane chunks
                cw = min(seq_chunk, L_pad - c0)
                nvalid = min(cw, Lout - c0)

                # Conv1d(Ci=1) as K shifted multiply-accumulates; init with the
                # k=0 tap + bias (saves a zeros + a full-size add).
                acc = x_sh[0][:, c0:c0 + cw][:, None, :] * w_taps[0] + b3
                for k in range(1, K):
                    acc = acc + x_sh[k][:, c0:c0 + cw][:, None, :] * w_taps[k]

                acc = jnp.maximum(acc, 0.0)          # ReLU
                if nvalid < cw:
                    # Zero out-of-range / wrapped tail (safe post-ReLU: values >= 0).
                    lane = jax.lax.broadcasted_iota(jnp.int32, acc.shape, 2)
                    acc = jnp.where(lane < nvalid, acc, 0.0)

                # Running global-max-pool over the sequence, chunk by chunk.
                run_max = jnp.maximum(run_max, jnp.max(acc, axis=2))
                c0 += cw

            feat_ref[:, i * Co:(i + 1) * Co] = run_max

        # Fused FC: one (TN, n_branches*Co) @ (n_branches*Co, C) MXU dot.
        logit = jnp.dot(feat_ref[...], fcw_ref[...],
                        preferred_element_type=jnp.float32)
        out_ref[...] = (logit + fcb_ref[...]).astype(out_ref.dtype)

    return kernel


def cnn1d_forward(x, conv_ws, conv_bs, fc_w, fc_b, Ks, Co, C,
                  *, batch_tile=64, seq_chunk=256):
    N, L = x.shape
    n_feat = len(Ks) * Co

    # Batch tile: multiple of 8 (fp32 sublane); sequence padded to a multiple of
    # 128 lanes so rolls and chunk slices stay lane-aligned.
    TN = min(_round_up(batch_tile, 8), _round_up(N, 8))
    N_pad = _round_up(N, TN)
    L_pad = _round_up(L, 128)
    seq_chunk = max(128, _round_up(seq_chunk, 128))

    x_p = jnp.pad(x.astype(jnp.float32), ((0, N_pad - N), (0, L_pad - L)))

    flat_inputs = [x_p]
    in_specs = [pl.BlockSpec((TN, L_pad), lambda i: (i, 0))]
    for w, b in zip(conv_ws, conv_bs):
        flat_inputs += [w, b]
        in_specs += [pl.BlockSpec(w.shape, lambda i: (0, 0)),
                     pl.BlockSpec(b.shape, lambda i: (0, 0))]
    flat_inputs += [fc_w, fc_b]
    in_specs += [pl.BlockSpec(fc_w.shape, lambda i: (0, 0)),
                 pl.BlockSpec(fc_b.shape, lambda i: (0, 0))]

    flops = (2 * N_pad * Co * sum(K * (L - K + 1) for K in Ks)
             + 2 * N_pad * n_feat * C)
    bytes_accessed = 4 * (x_p.size
                          + sum(w.size + b.size for w, b in zip(conv_ws, conv_bs))
                          + fc_w.size + fc_b.size + N_pad * C)

    out = pl.pallas_call(
        make_cnn1d_kernel(Ks, Co, C, L, L_pad, seq_chunk),
        out_shape=jax.ShapeDtypeStruct((N_pad, C), jnp.float32),
        grid=(N_pad // TN,),
        in_specs=in_specs,
        out_specs=pl.BlockSpec((TN, C), lambda i: (i, 0)),
        scratch_shapes=[pltpu.VMEM((TN, n_feat), jnp.float32)],
        compiler_params=pltpu.CompilerParams(
            dimension_semantics=("parallel",),
            vmem_limit_bytes=32 * 1024 * 1024,
        ),
        cost_estimate=pl.CostEstimate(
            flops=flops, transcendentals=0, bytes_accessed=bytes_accessed),
    )(*flat_inputs)
    return out[:N]


def reference_forward(x, conv_ws, conv_bs, fc_w, fc_b, Ks):
    """Pure-JAX reference matching the PyTorch forward (eval mode)."""
    feats = []
    for w, b, K in zip(conv_ws, conv_bs, Ks):
        Lout = x.shape[1] - K + 1
        patches = jnp.stack([x[:, t:t + K] for t in range(Lout)], axis=1)  # (N, Lout, K)
        conv = jnp.einsum('nlk,ck->ncl', patches, w) + b[0][None, :, None]
        feats.append(jnp.max(jax.nn.relu(conv), axis=2))
    h = jnp.concatenate(feats, axis=1)
    return h @ fc_w + fc_b[0]


if __name__ == "__main__":
    # args: kernel_num=8, kernel_sizes=[3, 4, 5], num_classes=4, dropout=0.5
    Ks = [3, 4, 5]
    Co = 8
    C = 4

    key = jax.random.PRNGKey(0)
    keys = jax.random.split(key, 2 * len(Ks) + 3)

    conv_ws, conv_bs = [], []
    for i, K in enumerate(Ks):
        conv_ws.append(0.1 * jax.random.normal(keys[2 * i], (Co, K), dtype=jnp.float32))
        conv_bs.append(0.1 * jax.random.normal(keys[2 * i + 1], (1, Co), dtype=jnp.float32))
    fc_w = 0.1 * jax.random.normal(keys[-3], (len(Ks) * Co, C), dtype=jnp.float32)
    fc_b = 0.1 * jax.random.normal(keys[-2], (1, C), dtype=jnp.float32)

    # Case 1: module-consistent small shapes. Case 2: exercises batch padding
    # and a multi-step parallel grid (N=20 padded to 24, 3 batch tiles of 8).
    for (N, L, btile) in [(2, 16, 64), (20, 40, 8)]:
        x = jax.random.normal(jax.random.fold_in(keys[-1], N), (N, L), dtype=jnp.float32)
        out = cnn1d_forward(x, conv_ws, conv_bs, fc_w, fc_b, Ks, Co, C,
                            batch_tile=btile)
        out = jax.block_until_ready(out)
        ref = reference_forward(x, conv_ws, conv_bs, fc_w, fc_b, Ks)
        assert out.shape == (N, C)
        assert jnp.allclose(out, ref, atol=2e-5, rtol=2e-5), (N, L, out, ref)

    print("KERNEL_OK")
</pallas_src>

<mosaic_0001>
module attributes {stable_mosaic.version = 11 : i64} {
  func.func @kernel(%arg0: i32, %arg1: memref<8x128xf32, #tpu.memory_space<vmem>>, %arg2: memref<8x3xf32, #tpu.memory_space<vmem>>, %arg3: memref<1x8xf32, #tpu.memory_space<vmem>>, %arg4: memref<8x4xf32, #tpu.memory_space<vmem>>, %arg5: memref<1x8xf32, #tpu.memory_space<vmem>>, %arg6: memref<8x5xf32, #tpu.memory_space<vmem>>, %arg7: memref<1x8xf32, #tpu.memory_space<vmem>>, %arg8: memref<24x4xf32, #tpu.memory_space<vmem>>, %arg9: memref<1x4xf32, #tpu.memory_space<vmem>>, %arg10: memref<8x4xf32, #tpu.memory_space<vmem>>, %arg11: memref<8x24xf32, #tpu.memory_space<vmem>>) attributes {dimension_semantics = [#tpu.dimension_semantics<parallel>], iteration_bounds = array<i64: 1>, scalar_prefetch = 0 : i64, scratch_operands = 1 : i64, tpu.core_type = #tpu.core_type<tc>, window_params = [{transform_indices = @transform_0, window_bounds = array<i64: 8, 128>}, {pipeline_mode = #tpu.pipeline_mode<synchronous>, transform_indices = @transform_1, window_bounds = array<i64: 8, 3>}, {pipeline_mode = #tpu.pipeline_mode<synchronous>, transform_indices = @transform_2, window_bounds = array<i64: 1, 8>}, {pipeline_mode = #tpu.pipeline_mode<synchronous>, transform_indices = @transform_3, window_bounds = array<i64: 8, 4>}, {pipeline_mode = #tpu.pipeline_mode<synchronous>, transform_indices = @transform_4, window_bounds = array<i64: 1, 8>}, {pipeline_mode = #tpu.pipeline_mode<synchronous>, transform_indices = @transform_5, window_bounds = array<i64: 8, 5>}, {pipeline_mode = #tpu.pipeline_mode<synchronous>, transform_indices = @transform_6, window_bounds = array<i64: 1, 8>}, {pipeline_mode = #tpu.pipeline_mode<synchronous>, transform_indices = @transform_7, window_bounds = array<i64: 24, 4>}, {pipeline_mode = #tpu.pipeline_mode<synchronous>, transform_indices = @transform_8, window_bounds = array<i64: 1, 4>}, {transform_indices = @transform_9, window_bounds = array<i64: 8, 4>}]} {
    %c0 = arith.constant 0 : index
    %c0_0 = arith.constant 0 : index
    %0 = vector.load %arg1[%c0, %c0_0] : memref<8x128xf32, #tpu.memory_space<vmem>>, vector<8x128xf32>
    %c127_i32 = arith.constant 127 : i32
    %1 = tpu.dynamic_rotate %0 by %c127_i32 dim 1 : vector<8x128xf32>, i32 -> vector<8x128xf32>
    %c126_i32 = arith.constant 126 : i32
    %2 = tpu.dynamic_rotate %0 by %c126_i32 dim 1 : vector<8x128xf32>, i32 -> vector<8x128xf32>
    %c125_i32 = arith.constant 125 : i32
    %3 = tpu.dynamic_rotate %0 by %c125_i32 dim 1 : vector<8x128xf32>, i32 -> vector<8x128xf32>
    %c124_i32 = arith.constant 124 : i32
    %4 = tpu.dynamic_rotate %0 by %c124_i32 dim 1 : vector<8x128xf32>, i32 -> vector<8x128xf32>
    %c0_1 = arith.constant 0 : index
    %c0_2 = arith.constant 0 : index
    %5 = vector.load %arg2[%c0_1, %c0_2] : memref<8x3xf32, #tpu.memory_space<vmem>>, vector<8x3xf32>
    %c0_3 = arith.constant 0 : index
    %c0_4 = arith.constant 0 : index
    %6 = vector.load %arg3[%c0_3, %c0_4] : memref<1x8xf32, #tpu.memory_space<vmem>>, vector<1x8xf32>
    %7 = vector.extract_strided_slice %5 {offsets = [0, 0], sizes = [8, 1], strides = [1, 1]} : vector<8x3xf32> to vector<8x1xf32>
    %8 = vector.shape_cast %7 : vector<8x1xf32> to vector<1x8x1xf32>
    %9 = vector.extract_strided_slice %5 {offsets = [0, 1], sizes = [8, 1], strides = [1, 1]} : vector<8x3xf32> to vector<8x1xf32>
    %10 = vector.shape_cast %9 : vector<8x1xf32> to vector<1x8x1xf32>
    %11 = vector.extract_strided_slice %5 {offsets = [0, 2], sizes = [8, 1], strides = [1, 1]} : vector<8x3xf32> to vector<8x1xf32>
    %12 = vector.shape_cast %11 : vector<8x1xf32> to vector<1x8x1xf32>
    %13 = vector.shape_cast %6 : vector<1x8xf32> to vector<1x8x1xf32>
    %cst = arith.constant 0.000000e+00 : f32
    %14 = vector.broadcast %cst : f32 to vector<8x8xf32>
    %15 = vector.shape_cast %0 : vector<8x128xf32> to vector<8x1x128xf32>
    %16 = vector.broadcast %15 : vector<8x1x128xf32> to vector<8x8x128xf32>
    %17 = vector.broadcast %8 : vector<1x8x1xf32> to vector<8x8x128xf32>
    %18 = arith.mulf %16, %17 : vector<8x8x128xf32>
    %19 = vector.broadcast %13 : vector<1x8x1xf32> to vector<8x8x128xf32>
    %20 = arith.addf %18, %19 : vector<8x8x128xf32>
    %21 = vector.shape_cast %1 : vector<8x128xf32> to vector<8x1x128xf32>
    %22 = vector.broadcast %21 : vector<8x1x128xf32> to vector<8x8x128xf32>
    %23 = vector.broadcast %10 : vector<1x8x1xf32> to vector<8x8x128xf32>
    %24 = arith.mulf %22, %23 : vector<8x8x128xf32>
    %25 = arith.addf %20, %24 : vector<8x8x128xf32>
    %26 = vector.shape_cast %2 : vector<8x128xf32> to vector<8x1x128xf32>
    %27 = vector.broadcast %26 : vector<8x1x128xf32> to vector<8x8x128xf32>
    %28 = vector.broadcast %12 : vector<1x8x1xf32> to vector<8x8x128xf32>
    %29 = arith.mulf %27, %28 : vector<8x8x128xf32>
    %30 = arith.addf %25, %29 : vector<8x8x128xf32>
    %cst_5 = arith.constant 0.000000e+00 : f32
    %31 = vector.broadcast %cst_5 : f32 to vector<8x8x128xf32>
    %32 = arith.maximumf %30, %31 : vector<8x8x128xf32>
    %33 = tpu.iota {dimensions = array<i32: 2>} : vector<8x8x128xi32>
    %c14_i32 = arith.constant 14 : i32
    %34 = vector.broadcast %c14_i32 : i32 to vector<8x8x128xi32>
    %35 = arith.cmpi slt, %33, %34 : vector<8x8x128xi32>
    %cst_6 = arith.constant 0.000000e+00 : f32
    %36 = vector.broadcast %cst_6 : f32 to vector<8x8x128xf32>
    %37 = arith.select %35, %32, %36 : vector<8x8x128xi1>, vector<8x8x128xf32>
    %cst_7 = arith.constant dense<0xFF800000> : vector<8x8xf32>
    %38 = vector.multi_reduction <maximumf>, %37, %cst_7 [2] : vector<8x8x128xf32> to vector<8x8xf32>
    %39 = arith.maximumf %14, %38 : vector<8x8xf32>
    %c0_8 = arith.constant 0 : index
    %c0_9 = arith.constant 0 : index
    %40 = vector.load %arg11[%c0_8, %c0_9] : memref<8x24xf32, #tpu.memory_space<vmem>>, vector<8x8xf32>
    tpu.vector_store %arg11[%c0_8, %c0_9], %39 {strides = array<i32>} : memref<8x24xf32, #tpu.memory_space<vmem>>, vector<8x8xf32>,
    %c0_10 = arith.constant 0 : index
    %c0_11 = arith.constant 0 : index
    %41 = vector.load %arg4[%c0_10, %c0_11] : memref<8x4xf32, #tpu.memory_space<vmem>>, vector<8x4xf32>
    %c0_12 = arith.constant 0 : index
    %c0_13 = arith.constant 0 : index
    %42 = vector.load %arg5[%c0_12, %c0_13] : memref<1x8xf32, #tpu.memory_space<vmem>>, vector<1x8xf32>
    %43 = vector.extract_strided_slice %41 {offsets = [0, 0], sizes = [8, 1], strides = [1, 1]} : vector<8x4xf32> to vector<8x1xf32>
    %44 = vector.shape_cast %43 : vector<8x1xf32> to vector<1x8x1xf32>
    %45 = vector.extract_strided_slice %41 {offsets = [0, 1], sizes = [8, 1], strides = [1, 1]} : vector<8x4xf32> to vector<8x1xf32>
    %46 = vector.shape_cast %45 : vector<8x1xf32> to vector<1x8x1xf32>
    %47 = vector.extract_strided_slice %41 {offsets = [0, 2], sizes = [8, 1], strides = [1, 1]} : vector<8x4xf32> to vector<8x1xf32>
    %48 = vector.shape_cast %47 : vector<8x1xf32> to vector<1x8x1xf32>
    %49 = vector.extract_strided_slice %41 {offsets = [0, 3], sizes = [8, 1], strides = [1, 1]} : vector<8x4xf32> to vector<8x1xf32>
    %50 = vector.shape_cast %49 : vector<8x1xf32> to vector<1x8x1xf32>
    %51 = vector.shape_cast %42 : vector<1x8xf32> to vector<1x8x1xf32>
    %cst_14 = arith.constant 0.000000e+00 : f32
    %52 = vector.broadcast %cst_14 : f32 to vector<8x8xf32>
    %53 = vector.shape_cast %0 : vector<8x128xf32> to vector<8x1x128xf32>
    %54 = vector.broadcast %53 : vector<8x1x128xf32> to vector<8x8x128xf32>
    %55 = vector.broadcast %44 : vector<1x8x1xf32> to vector<8x8x128xf32>
    %56 = arith.mulf %54, %55 : vector<8x8x128xf32>
    %57 = vector.broadcast %51 : vector<1x8x1xf32> to vector<8x8x128xf32>
    %58 = arith.addf %56, %57 : vector<8x8x128xf32>
    %59 = vector.shape_cast %1 : vector<8x128xf32> to vector<8x1x128xf32>
    %60 = vector.broadcast %59 : vector<8x1x128xf32> to vector<8x8x128xf32>
    %61 = vector.broadcast %46 : vector<1x8x1xf32> to vector<8x8x128xf32>
    %62 = arith.mulf %60, %61 : vector<8x8x128xf32>
    %63 = arith.addf %58, %62 : vector<8x8x128xf32>
    %64 = vector.shape_cast %2 : vector<8x128xf32> to vector<8x1x128xf32>
    %65 = vector.broadcast %64 : vector<8x1x128xf32> to vector<8x8x128xf32>
    %66 = vector.broadcast %48 : vector<1x8x1xf32> to vector<8x8x128xf32>
    %67 = arith.mulf %65, %66 : vector<8x8x128xf32>
    %68 = arith.addf %63, %67 : vector<8x8x128xf32>
    %69 = vector.shape_cast %3 : vector<8x128xf32> to vector<8x1x128xf32>
    %70 = vector.broadcast %69 : vector<8x1x128xf32> to vector<8x8x128xf32>
    %71 = vector.broadcast %50 : vector<1x8x1xf32> to vector<8x8x128xf32>
    %72 = arith.mulf %70, %71 : vector<8x8x128xf32>
    %73 = arith.addf %68, %72 : vector<8x8x128xf32>
    %cst_15 = arith.constant 0.000000e+00 : f32
    %74 = vector.broadcast %cst_15 : f32 to vector<8x8x128xf32>
    %75 = arith.maximumf %73, %74 : vector<8x8x128xf32>
    %76 = tpu.iota {dimensions = array<i32: 2>} : vector<8x8x128xi32>
    %c13_i32 = arith.constant 13 : i32
    %77 = vector.broadcast %c13_i32 : i32 to vector<8x8x128xi32>
    %78 = arith.cmpi slt, %76, %77 : vector<8x8x128xi32>
    %cst_16 = arith.constant 0.000000e+00 : f32
    %79 = vector.broadcast %cst_16 : f32 to vector<8x8x128xf32>
    %80 = arith.select %78, %75, %79 : vector<8x8x128xi1>, vector<8x8x128xf32>
    %cst_17 = arith.constant dense<0xFF800000> : vector<8x8xf32>
    %81 = vector.multi_reduction <maximumf>, %80, %cst_17 [2] : vector<8x8x128xf32> to vector<8x8xf32>
    %82 = arith.maximumf %52, %81 : vector<8x8xf32>
    %c0_18 = arith.constant 0 : index
    %c8 = arith.constant 8 : index
    %83 = vector.load %arg11[%c0_18, %c8] : memref<8x24xf32, #tpu.memory_space<vmem>>, vector<8x8xf32>
    tpu.vector_store %arg11[%c0_18, %c8], %82 {strides = array<i32>} : memref<8x24xf32, #tpu.memory_space<vmem>>, vector<8x8xf32>,
    %c0_19 = arith.constant 0 : index
    %c0_20 = arith.constant 0 : index
    %84 = vector.load %arg6[%c0_19, %c0_20] : memref<8x5xf32, #tpu.memory_space<vmem>>, vector<8x5xf32>
    %c0_21 = arith.constant 0 : index
    %c0_22 = arith.constant 0 : index
    %85 = vector.load %arg7[%c0_21, %c0_22] : memref<1x8xf32, #tpu.memory_space<vmem>>, vector<1x8xf32>
    %86 = vector.extract_strided_slice %84 {offsets = [0, 0], sizes = [8, 1], strides = [1, 1]} : vector<8x5xf32> to vector<8x1xf32>
    %87 = vector.shape_cast %86 : vector<8x1xf32> to vector<1x8x1xf32>
    %88 = vector.extract_strided_slice %84 {offsets = [0, 1], sizes = [8, 1], strides = [1, 1]} : vector<8x5xf32> to vector<8x1xf32>
    %89 = vector.shape_cast %88 : vector<8x1xf32> to vector<1x8x1xf32>
    %90 = vector.extract_strided_slice %84 {offsets = [0, 2], sizes = [8, 1], strides = [1, 1]} : vector<8x5xf32> to vector<8x1xf32>
    %91 = vector.shape_cast %90 : vector<8x1xf32> to vector<1x8x1xf32>
    %92 = vector.extract_strided_slice %84 {offsets = [0, 3], sizes = [8, 1], strides = [1, 1]} : vector<8x5xf32> to vector<8x1xf32>
    %93 = vector.shape_cast %92 : vector<8x1xf32> to vector<1x8x1xf32>
    %94 = vector.extract_strided_slice %84 {offsets = [0, 4], sizes = [8, 1], strides = [1, 1]} : vector<8x5xf32> to vector<8x1xf32>
    %95 = vector.shape_cast %94 : vector<8x1xf32> to vector<1x8x1xf32>
    %96 = vector.shape_cast %85 : vector<1x8xf32> to vector<1x8x1xf32>
    %cst_23 = arith.constant 0.000000e+00 : f32
    %97 = vector.broadcast %cst_23 : f32 to vector<8x8xf32>
    %98 = vector.shape_cast %0 : vector<8x128xf32> to vector<8x1x128xf32>
    %99 = vector.broadcast %98 : vector<8x1x128xf32> to vector<8x8x128xf32>
    %100 = vector.broadcast %87 : vector<1x8x1xf32> to vector<8x8x128xf32>
    %101 = arith.mulf %99, %100 : vector<8x8x128xf32>
    %102 = vector.broadcast %96 : vector<1x8x1xf32> to vector<8x8x128xf32>
    %103 = arith.addf %101, %102 : vector<8x8x128xf32>
    %104 = vector.shape_cast %1 : vector<8x128xf32> to vector<8x1x128xf32>
    %105 = vector.broadcast %104 : vector<8x1x128xf32> to vector<8x8x128xf32>
    %106 = vector.broadcast %89 : vector<1x8x1xf32> to vector<8x8x128xf32>
    %107 = arith.mulf %105, %106 : vector<8x8x128xf32>
    %108 = arith.addf %103, %107 : vector<8x8x128xf32>
    %109 = vector.shape_cast %2 : vector<8x128xf32> to vector<8x1x128xf32>
    %110 = vector.broadcast %109 : vector<8x1x128xf32> to vector<8x8x128xf32>
    %111 = vector.broadcast %91 : vector<1x8x1xf32> to vector<8x8x128xf32>
    %112 = arith.mulf %110, %111 : vector<8x8x128xf32>
    %113 = arith.addf %108, %112 : vector<8x8x128xf32>
    %114 = vector.shape_cast %3 : vector<8x128xf32> to vector<8x1x128xf32>
    %115 = vector.broadcast %114 : vector<8x1x128xf32> to vector<8x8x128xf32>
    %116 = vector.broadcast %93 : vector<1x8x1xf32> to vector<8x8x128xf32>
    %117 = arith.mulf %115, %116 : vector<8x8x128xf32>
    %118 = arith.addf %113, %117 : vector<8x8x128xf32>
    %119 = vector.shape_cast %4 : vector<8x128xf32> to vector<8x1x128xf32>
    %120 = vector.broadcast %119 : vector<8x1x128xf32> to vector<8x8x128xf32>
    %121 = vector.broadcast %95 : vector<1x8x1xf32> to vector<8x8x128xf32>
    %122 = arith.mulf %120, %121 : vector<8x8x128xf32>
    %123 = arith.addf %118, %122 : vector<8x8x128xf32>
    %cst_24 = arith.constant 0.000000e+00 : f32
    %124 = vector.broadcast %cst_24 : f32 to vector<8x8x128xf32>
    %125 = arith.maximumf %123, %124 : vector<8x8x128xf32>
    %126 = tpu.iota {dimensions = array<i32: 2>} : vector<8x8x128xi32>
    %c12_i32 = arith.constant 12 : i32
    %127 = vector.broadcast %c12_i32 : i32 to vector<8x8x128xi32>
    %128 = arith.cmpi slt, %126, %127 : vector<8x8x128xi32>
    %cst_25 = arith.constant 0.000000e+00 : f32
    %129 = vector.broadcast %cst_25 : f32 to vector<8x8x128xf32>
    %130 = arith.select %128, %125, %129 : vector<8x8x128xi1>, vector<8x8x128xf32>
    %cst_26 = arith.constant dense<0xFF800000> : vector<8x8xf32>
    %131 = vector.multi_reduction <maximumf>, %130, %cst_26 [2] : vector<8x8x128xf32> to vector<8x8xf32>
    %132 = arith.maximumf %97, %131 : vector<8x8xf32>
    %c0_27 = arith.constant 0 : index
    %c16 = arith.constant 16 : index
    %133 = vector.load %arg11[%c0_27, %c16] : memref<8x24xf32, #tpu.memory_space<vmem>>, vector<8x8xf32>
    tpu.vector_store %arg11[%c0_27, %c16], %132 {strides = array<i32>} : memref<8x24xf32, #tpu.memory_space<vmem>>, vector<8x8xf32>,
    %c0_28 = arith.constant 0 : index
    %c0_29 = arith.constant 0 : index
    %134 = vector.load %arg11[%c0_28, %c0_29] : memref<8x24xf32, #tpu.memory_space<vmem>>, vector<8x24xf32>
    %c0_30 = arith.constant 0 : index
    %c0_31 = arith.constant 0 : index
    %135 = vector.load %arg8[%c0_30, %c0_31] : memref<24x4xf32, #tpu.memory_space<vmem>>, vector<24x4xf32>
    %cst_32 = arith.constant dense<0.000000e+00> : vector<8x4xf32>
    %136 = tpu.matmul %134, %135, %cst_32 {dimension_numbers = #tpu.dot_dimension_numbers<[1], [0], [0], [1], [0, 0, 1, 1], [], []>} : vector<8x24xf32>, vector<24x4xf32>, vector<8x4xf32> -> vector<8x4xf32>
    %c0_33 = arith.constant 0 : index
    %c0_34 = arith.constant 0 : index
    %137 = vector.load %arg9[%c0_33, %c0_34] : memref<1x4xf32, #tpu.memory_space<vmem>>, vector<1x4xf32>
    %138 = vector.broadcast %137 : vector<1x4xf32> to vector<8x4xf32>
    %139 = arith.addf %136, %138 : vector<8x4xf32>
    %c0_35 = arith.constant 0 : index
    %c0_36 = arith.constant 0 : index
    %140 = vector.load %arg10[%c0_35, %c0_36] : memref<8x4xf32, #tpu.memory_space<vmem>>, vector<8x4xf32>
    tpu.vector_store %arg10[%c0_35, %c0_36], %139 {strides = array<i32>} : memref<8x4xf32, #tpu.memory_space<vmem>>, vector<8x4xf32>,
    return
  }
  func.func @transform_0(%arg0: i32) -> (i32, i32) {
    %c0_i32 = arith.constant 0 : i32
    %c0_i32_0 = arith.constant 0 : i32
    return %arg0, %c0_i32 : i32, i32
  }
  func.func @transform_1(%arg0: i32) -> (i32, i32) {
    %c0_i32 = arith.constant 0 : i32
    %c0_i32_0 = arith.constant 0 : i32
    %c0_i32_1 = arith.constant 0 : i32
    return %c0_i32, %c0_i32_0 : i32, i32
  }
  func.func @transform_2(%arg0: i32) -> (i32, i32) {
    %c0_i32 = arith.constant 0 : i32
    %c0_i32_0 = arith.constant 0 : i32
    %c0_i32_1 = arith.constant 0 : i32
    return %c0_i32, %c0_i32_0 : i32, i32
  }
  func.func @transform_3(%arg0: i32) -> (i32, i32) {
    %c0_i32 = arith.constant 0 : i32
    %c0_i32_0 = arith.constant 0 : i32
    %c0_i32_1 = arith.constant 0 : i32
    return %c0_i32, %c0_i32_0 : i32, i32
  }
  func.func @transform_4(%arg0: i32) -> (i32, i32) {
    %c0_i32 = arith.constant 0 : i32
    %c0_i32_0 = arith.constant 0 : i32
    %c0_i32_1 = arith.constant 0 : i32
    return %c0_i32, %c0_i32_0 : i32, i32
  }
  func.func @transform_5(%arg0: i32) -> (i32, i32) {
    %c0_i32 = arith.constant 0 : i32
    %c0_i32_0 = arith.constant 0 : i32
    %c0_i32_1 = arith.constant 0 : i32
    return %c0_i32, %c0_i32_0 : i32, i32
  }
  func.func @transform_6(%arg0: i32) -> (i32, i32) {
    %c0_i32 = arith.constant 0 : i32
    %c0_i32_0 = arith.constant 0 : i32
    %c0_i32_1 = arith.constant 0 : i32
    return %c0_i32, %c0_i32_0 : i32, i32
  }
  func.func @transform_7(%arg0: i32) -> (i32, i32) {
    %c0_i32 = arith.constant 0 : i32
    %c0_i32_0 = arith.constant 0 : i32
    %c0_i32_1 = arith.constant 0 : i32
    return %c0_i32, %c0_i32_0 : i32, i32
  }
  func.func @transform_8(%arg0: i32) -> (i32, i32) {
    %c0_i32 = arith.constant 0 : i32
    %c0_i32_0 = arith.constant 0 : i32
    %c0_i32_1 = arith.constant 0 : i32
    return %c0_i32, %c0_i32_0 : i32, i32
  }
  func.func @transform_9(%arg0: i32) -> (i32, i32) {
    %c0_i32 = arith.constant 0 : i32
    %c0_i32_0 = arith.constant 0 : i32
    return %arg0, %c0_i32 : i32, i32
  }
}

</mosaic_0001>

<bundles_post_ra>
// kernel: tpu_custom_call.1
= control target key start
LH: loop header
LB: loop body
LE: loop exit
PB: predicated region body
PF: predicated region fallthrough
CT: control target
= control target key end

     0   :  { %v1181_v0 = vmov 0   ;;  %s1182_s17 = smov 127   ;;  %v1183_v5 = vmov 1   ;;  %v1185_v6 = vmov 2   ;;  %v1187_v7 = vmov 3   ;;  %s1188_s18 = smov 124   ;;  %s1832_s5 = inlined_call_operand.vmem [shape: f32[8,5], index: 5, kind: input, shape index: {}]   ;;  %s1833_s3 = inlined_call_operand.vmem [shape: f32[8,4], index: 3, kind: input, shape index: {}]   ;;  %s1834_s1 = inlined_call_operand.vmem [shape: f32[8,3], index: 1, kind: input, shape index: {}]   ;;  %s1835_s0 = inlined_call_operand.vmem [shape: f32[8,128], index: 0, kind: input, shape index: {}]   ;;  %s1836_s4 = inlined_call_operand.vmem [shape: f32[1,8], index: 4, kind: input, shape index: {}]   ;;  %s1837_s6 = inlined_call_operand.vmem [shape: f32[1,8], index: 6, kind: input, shape index: {}]   ;;  %s1838_s2 = inlined_call_operand.vmem [shape: f32[1,8], index: 2, kind: input, shape index: {}]   ;;  %s1839_s7 = inlined_call_operand.vmem [shape: f32[24,4], index: 7, kind: input, shape index: {}]   ;;  %s1840_s8 = inlined_call_operand.vmem [shape: f32[1,4], index: 8, kind: input, shape index: {}]   ;;  %s1841_s9 = inlined_call_operand.vmem [shape: f32[8,4], index: 9, kind: output, shape index: {}]  }
   0x1   :  { %1171 = vset.pattern.permute.xlu1 %v1181_v0  ;;  %1170 = vset.pattern.permute.xlu0 %v1181_v0  ;;  %v753_v1 = vld [vmem:[%s1832_s5] sm:$0xff]  ;;  %s1184_s5 = smov 126   ;;  %v1189_v9 = vmov 4   ;;  %v1190_v12 = vmov 1966171168   ;;  %v55_v14 = vlaneseq  ;;  %vm1192_vm3 = vmmov 0  }
   0x2   :  { %v481_v2 = vld [vmem:[%s1833_s3] sm:$0xff]  ;;  %764 = vperm.xlu0 %1170, %v753_v1   ;;  %s1186_s3 = smov 125   ;;  %v53_v13 = vunpack.c.l.s4 %v1190_v12  ;;  %vm464_vm4 = vcmask 1041409   ;;  %vm466_vm5 = vcmask 1042434   ;;  %vm468_vm6 = vcmask 1043459  }
   0x3   :  { %492 = vperm.xlu1 %1171, %v481_v2   ;;  %v41_v3 = vld [vmem:[%s1834_s1] sm:$0xff]  ;;  %v1265_v16 = vshrl.u32 %v55_v14, 7  ;;  %v1298_v52 = vand.u32 127, %v55_v14  ;;  %vm470_vm7 = vcmask 1044484   ;;  %vm472_vm8 = vcmask 1045509  }
   0x4   :  { %v32_v4 = vld [vmem:[%s1835_s0] sm:$0xff]  ;;  %v54_v15 = vunpack.c.0.s8 %v53_v13  ;;  %vm474_vm9 = vcmask 1046534   ;;  %vm476_vm10 = vcmask 1047559   ;;  %vm479_vm11 = vcmask 64512  }
   0x5   :  { %v1137_v8 = vld [vmem:[%s1836_s4] ss:$0 sm:$0xff]  ;;  %1864 = vst [vmem:[#allocation3_spill] sm:$0xff] %v1265_v16  ;;  %v51_v17 = vcombine.high %v32_v4, %v32_v4  ;;  %v1275_v25 = vsub.s32 0, %v1265_v16  ;;  %vm391_vm0 = vcmp.lt.s32.totalorder %v1298_v52, 14  ;;  %vm669_vm1 = vcmp.lt.s32.totalorder %v1298_v52, 13 }
   0x6   :  { %33 = vrot.lane.b32.xlu0 %v32_v4, %s1182_s17  ;;  %v1138_v10 = vld [vmem:[%s1837_s6] ss:$0 sm:$0xff]  ;;  %v1268_v18 = vsub.s32 %v54_v15, %v1265_v16  ;;  %vm961_vm2 = vcmp.lt.s32.totalorder %v1298_v52, 12  ;;  %vm751_vm12 = vcmask 130112   ;;  %vm1043_vm13 = vcmask 195712  }
   0x7   :  { %142 = vperm.xlu1 %1171, %v41_v3   ;;  %1172 = vset.pattern.permute.xlu0 %v1183_v5  ;;  %v1136_v11 = vld [vmem:[%s1838_s2] ss:$0 sm:$0xff]  ;;  %vm1056_vm14 = vcmask 195584   ;;  %vm1130_vm15 = vcmask 31744  }
   0x8   :  { %v65_v19 = vrot.slane %v51_v17, %v1268_v18  ;;  %v58_v21 = vrot.slane %v32_v4, %v1268_v18 }
   0xa   :  { %784 = vperm.xlu0 %1172, %v753_v1   ;;  %v67_v20 = vcombine.high %v65_v19, %v65_v19  ;;  %v81_v22 = vrot.slane %v65_v19, %v1268_v18  ;;  %v66_v24 = vcombine.high %v58_v21, %v58_v21  ;;  %v74_v28 = vrot.slane %v58_v21, %v1268_v18 }
   0xb   :  { %35 = vrot.lane.b32.xlu1 %v32_v4, %s1184_s5 }
   0xc   :  { %1173 = vset.pattern.permute.xlu1 %v1183_v5  ;;  %v95_v23 = vrot.slane %v67_v20, %v1268_v18  ;;  %v97_v26 = vcombine.high %v81_v22, %v81_v22  ;;  %v88_v29 = vrot.slane %v66_v24, %v1268_v18  ;;  %v96_v34 = vcombine.high %v74_v28, %v74_v28 }
   0xd   :  { %v103_v40 = vrot.slane %v74_v28, %v1275_v25  ;;  %v119_v43 = vrot.slane %v81_v22, %v1275_v25 }
   0xe   :  { %252 = vperm.xlu0 %1172, %v41_v3   ;;  %v99_v27 = vcombine.high %v95_v23, %v95_v23  ;;  %v1280_v30 = vrot.slane %v97_v26, %v1275_v25  ;;  %v98_v35 = vcombine.high %v88_v29, %v88_v29  ;;  %v107_v41 = vrot.slane %v88_v29, %v1275_v25 }
   0xf   :  { %512 = vperm.xlu1 %1173, %v481_v2   ;;  %v111_v42 = vrot.slane %v96_v34, %v1275_v25  ;;  %v123_v46 = vrot.slane %v95_v23, %v1275_v25 }
  0x10   :  { %v131_v31 = vrot.slane %v99_v27, %v1275_v25  ;;  %v115_v47 = vrot.slane %v98_v35, %v1275_v25 }
  0x12   :  { %37 = vrot.lane.b32.xlu0 %v32_v4, %s1186_s3 }
  0x13   :  { %1174 = vset.pattern.permute.xlu1 %v1185_v6  ;;  %1175 = vset.pattern.permute.xlu0 %v1185_v6 }
  0x14   :  { %804 = vperm.xlu1 %1174, %v753_v1  }
  0x16   :  { %362 = vperm.xlu0 %1175, %v41_v3  }
  0x18   :  { %532 = vperm.xlu1 %1174, %v481_v2  }
  0x1a   :  { %1177 = vset.pattern.permute.xlu0 %v1187_v7 }
  0x1b   :  { %642 = vperm.xlu0 %1177, %v481_v2  }
  0x1c   :  { %1176 = vset.pattern.permute.xlu1 %v1187_v7 }
  0x1d   :  { %824 = vperm.xlu1 %1176, %v753_v1  }
  0x1f   :  { %488 = vbcast.lane.b32.xlu0 %v1137_v8, 256 }
  0x20   :  { %1179 = vset.pattern.permute.xlu0 %v1189_v9 }
  0x21   :  { %39 = vrot.lane.b32.xlu1 %v32_v4, %s1188_s18 }
  0x22   :  { %1178 = vset.pattern.permute.xlu1 %v1189_v9 }
  0x25   :  { %934 = vperm.xlu1 %1178, %v753_v1  }
  0x29   :  { %760 = vbcast.lane.b32.xlu1 %v1138_v10, 256 }
  0x2d   :  { %48 = vbcast.lane.b32.xlu1 %v1136_v11, 256 }
  0x81   :  { %v765_v32 = vpop.permute.xlu0 %764 }
  0x82   :  { %v493_v33 = vpop.permute.xlu1 %492  ;;  %v1313_v61 = vmul.f32 %v765_v32, %v107_v41  ;;  %v1315_v62 = vmul.f32 %v765_v32, %v115_v47  ;;  %v1318_v1 = vmul.f32 %v765_v32, %v103_v40  ;;  %v1320_v2 = vmul.f32 %v765_v32, %v123_v46 }
  0x83   :  { %v1284_v36 = vmul.f32 %v493_v33, %v1280_v30  ;;  %v1286_v37 = vmul.f32 %v493_v33, %v131_v31  ;;  %v1300_v53 = vmul.f32 %v493_v33, %v107_v41  ;;  %v1302_v54 = vmul.f32 %v493_v33, %v111_v42 }
  0x84   :  { %v1304_v55 = vmul.f32 %v493_v33, %v103_v40  ;;  %v1306_v56 = vmul.f32 %v493_v33, %v115_v47  ;;  %v1308_v57 = vmul.f32 %v493_v33, %v119_v43  ;;  %v1310_v58 = vmul.f32 %v493_v33, %v123_v46  ;;  %1868 = vst [vmem:[#allocation7_spill] sm:$0xff] %v1313_v61 }
  0x85   :  { %1865 = vst [vmem:[#allocation4_spill] sm:$0xff] %v1284_v36  ;;  %1866 = vst [vmem:[#allocation5_spill] sm:$0xff] %v1286_v37  ;;  %v34_v39 = vpop.permute.xlu0 %33  ;;  %v1328_v7 = vmul.f32 %v765_v32, %v111_v42  ;;  %v1331_v8 = vmul.f32 %v765_v32, %v1280_v30  ;;  %v1334_v11 = vmul.f32 %v765_v32, %v119_v43 }
  0x86   :  { %v143_v38 = vpop.permute.xlu1 %142  ;;  %v162_v44 = vcombine.high %v34_v39, %v34_v39  ;;  %v169_v45 = vrot.slane %v34_v39, %v1268_v18  ;;  %1869 = vst [vmem:[#allocation8_spill] sm:$0xff] %v1315_v62  ;;  %1870 = vst [vmem:[#allocation9_spill] sm:$0xff] %v1318_v1  ;;  %v1336_v12 = vmul.f32 %v765_v32, %v131_v31 }
  0x87   :  { %1871 = vst [vmem:[#allocation10_spill] sm:$0xff] %v1320_v2  ;;  %1872 = vst [vmem:[#allocation11_spill] sm:$0xff] %v1328_v7  ;;  %v1338_v14 = vmul.f32 %v143_v38, %v103_v40  ;;  %v1340_v15 = vmul.f32 %v143_v38, %v107_v41  ;;  %v1342_v17 = vmul.f32 %v143_v38, %v111_v42 }
  0x88   :  { %v176_v48 = vrot.slane %v162_v44, %v1268_v18  ;;  %v177_v49 = vcombine.high %v169_v45, %v169_v45  ;;  %v185_v0 = vrot.slane %v169_v45, %v1268_v18  ;;  %1873 = vst [vmem:[#allocation12_spill] sm:$0xff] %v1331_v8  ;;  %1874 = vst [vmem:[#allocation13_spill] sm:$0xff] %v1334_v11 }
  0x89   :  { %v1296_v51 = vpop.permute.xlu0 %784  ;;  %1875 = vst [vmem:[#allocation14_spill] sm:$0xff] %v1336_v12  ;;  %v1345_v21 = vmul.f32 %v143_v38, %v123_v46  ;;  %v1347_v22 = vmul.f32 %v143_v38, %v115_v47  ;;  %v1350_v27 = vmul.f32 %v143_v38, %v131_v31  ;;  %v1352_v28 = vmul.f32 %v143_v38, %v119_v43 }
  0x8a   :  { %v36_v50 = vpop.permute.xlu1 %35  ;;  %1867 = vst [vmem:[#allocation6_spill] sm:$0xff] %v1296_v51  ;;  %v178_v63 = vcombine.high %v176_v48, %v176_v48  ;;  %v199_v3 = vrot.slane %v177_v49, %v1268_v18  ;;  %v192_v9 = vrot.slane %v176_v48, %v1268_v18  ;;  %v207_v20 = vcombine.high %v185_v0, %v185_v0 }
  0x8b   :  { %v272_v59 = vcombine.high %v36_v50, %v36_v50  ;;  %v279_v60 = vrot.slane %v36_v50, %v1268_v18  ;;  %v1358_v35 = vmul.f32 %v143_v38, %v1280_v30  ;;  %v1361_v39 = vrot.slane %v185_v0, %v1275_v25 }
  0x8c   :  { %v206_v19 = vrot.slane %v178_v63, %v1268_v18  ;;  %v209_v23 = vcombine.high %v199_v3, %v199_v3  ;;  %v208_v29 = vcombine.high %v192_v9, %v192_v9  ;;  %v1364_v40 = vrot.slane %v199_v3, %v1275_v25 }
  0x8d   :  { %v286_v4 = vrot.slane %v272_v59, %v1268_v18  ;;  %v1326_v6 = vpop.permute.xlu0 %252  ;;  %v287_v10 = vcombine.high %v279_v60, %v279_v60  ;;  %v295_v24 = vrot.slane %v279_v60, %v1268_v18  ;;  %1877 = vst [vmem:[#allocation16_spill] sm:$0xff] %v1361_v39  ;;  %v1369_v43 = vrot.slane %v207_v20, %v1275_v25 }
  0x8e   :  { %v1324_v5 = vpop.permute.xlu1 %512  ;;  %1878 = vst [vmem:[#allocation17_spill] sm:$0xff] %v1364_v40  ;;  %v210_v42 = vcombine.high %v206_v19, %v206_v19  ;;  %v1372_v44 = vrot.slane %v192_v9, %v1275_v25  ;;  %v1376_v38 = vrot.slane %v209_v23, %v1275_v25  ;;  %v1379_v45 = vrot.slane %v206_v19, %v1275_v25 }
  0x8f   :  { %v288_v13 = vcombine.high %v286_v4, %v286_v4  ;;  %v309_v32 = vrot.slane %v287_v10, %v1268_v18  ;;  %1879 = vst [vmem:[#allocation18_spill] sm:$0xff] %v1369_v43  ;;  %v302_v30 = vrot.slane %v286_v4, %v1268_v18  ;;  %v317_v46 = vcombine.high %v295_v24, %v295_v24 }
  0x90   :  { %1880 = vst [vmem:[#allocation19_spill] sm:$0xff] %v1379_v45  ;;  %v1385_v49 = vrot.slane %v208_v29, %v1275_v25  ;;  %v1391_v63 = vmul.f32 %v1326_v6, %v1361_v39  ;;  %v1395_v3 = vmul.f32 %v1326_v6, %v1364_v40  ;;  %v1399_v4 = vmul.f32 %v1326_v6, %v1369_v43 }
  0x91   :  { %v38_v26 = vpop.permute.xlu0 %37  ;;  %v316_v31 = vrot.slane %v288_v13, %v1268_v18  ;;  %v319_v50 = vcombine.high %v309_v32, %v309_v32  ;;  %v1403_v9 = vmul.f32 %v1326_v6, %v1379_v45  ;;  %v318_v10 = vcombine.high %v302_v30, %v302_v30 }
  0x92   :  { %v552_v33 = vcombine.high %v38_v26, %v38_v26  ;;  %v559_v41 = vrot.slane %v38_v26, %v1268_v18  ;;  %v1406_v13 = vrot.slane %v295_v24, %v1275_v25  ;;  %v1409_v19 = vrot.slane %v309_v32, %v1275_v25 }
  0x93   :  { %v1355_v34 = vpop.permute.xlu1 %804  ;;  %v320_v0 = vcombine.high %v316_v31, %v316_v31  ;;  %v1413_v23 = vrot.slane %v317_v46, %v1275_v25  ;;  %v1416_v26 = vrot.slane %v302_v30, %v1275_v25  ;;  %v1425_v24 = vrot.slane %v316_v31, %v1275_v25 }
  0x94   :  { %1876 = vst [vmem:[#allocation15_spill] sm:$0xff] %v1355_v34  ;;  %v566_v47 = vrot.slane %v552_v33, %v1268_v18  ;;  %v567_v59 = vcombine.high %v559_v41, %v559_v41  ;;  %1881 = vst [vmem:[#allocation20_spill] sm:$0xff] %v1406_v13  ;;  %v575_v20 = vrot.slane %v559_v41, %v1268_v18 }
  0x95   :  { %v1382_v48 = vpop.permute.xlu0 %362  ;;  %1882 = vst [vmem:[#allocation21_spill] sm:$0xff] %v1409_v19  ;;  %1883 = vst [vmem:[#allocation22_spill] sm:$0xff] %v1413_v23  ;;  %v1429_v32 = vmul.f32 %v1326_v6, %v1376_v38  ;;  %v1432_v41 = vrot.slane %v319_v50, %v1275_v25  ;;  %v1448_v31 = vmul.f32 %v1326_v6, %v1372_v44 }
  0x96   :  { %1884 = vst [vmem:[#allocation23_spill] sm:$0xff] %v1416_v26  ;;  %v568_v29 = vcombine.high %v566_v47, %v566_v47  ;;  %v1419_v33 = vrot.slane %v566_v47, %v1268_v18  ;;  %v589_v16 = vrot.slane %v567_v59, %v1268_v18  ;;  %1885 = vst [vmem:[#allocation24_spill] sm:$0xff] %v1425_v24 }
  0x97   :  { %v1387_v60 = vpop.permute.xlu1 %532  ;;  %v1438_v46 = vmul.f32 %v1382_v48, %v1406_v13  ;;  %v1441_v47 = vrot.slane %v210_v42, %v1275_v25  ;;  %v1444_v59 = vrot.slane %v320_v0, %v1275_v25  ;;  %1888 = vst [vmem:[#allocation27_spill] sm:$0xff] %v1448_v31  ;;  %v597_v11 = vcombine.high %v575_v20, %v575_v20 }
  0x98   :  { %v1451_v50 = vrot.slane %v575_v20, %v1275_v25  ;;  %v1455_v8 = vmul.f32 %v1382_v48, %v1409_v19  ;;  %v1459_v7 = vmul.f32 %v1382_v48, %v1413_v23  ;;  %v1462_v42 = vrot.slane %v568_v29, %v1268_v18 }
  0x99   :  { %1887 = vst [vmem:[#allocation26_spill] sm:$0xff] %v1441_v47  ;;  %v1468_v2 = vmul.f32 %v1382_v48, %v1425_v24  ;;  %v1472_v20 = vmul.f32 %v1382_v48, %v1432_v41  ;;  %v599_v1 = vcombine.high %v589_v16, %v589_v16  ;;  %v1478_v37 = vmul.f32 %v1326_v6, %v1441_v47 }
  0x9a   :  { %v1422_v12 = vpop.permute.xlu0 %642  ;;  %1889 = vst [vmem:[#allocation28_spill] sm:$0xff] %v1451_v50  ;;  %1890 = vst [vmem:[#allocation29_spill] sm:$0xff] %v1462_v42  ;;  %v516_v29 = vmul.f32 %v1324_v5, %v1364_v40  ;;  %v536_v0 = vmul.f32 %v1387_v60, %v1409_v19  ;;  %v517_v40 = vmul.f32 %v1324_v5, %v1369_v43 }
  0x9b   :  { %1891 = vst [vmem:[#allocation30_spill] sm:$0xff] %v1472_v20  ;;  %v515_v19 = vmul.f32 %v1324_v5, %v1361_v39  ;;  %v1508_v45 = vrot.slane %v597_v11, %v1275_v25 }
  0x9c   :  { %v1434_v30 = vpop.permute.xlu1 %824 }
  0x9d   :  { %1886 = vst [vmem:[#allocation25_spill] sm:$0xff] %v1434_v30  ;;  %1892 = vst [vmem:[#allocation31_spill] sm:$0xff] %v1508_v45 }
  0x9e   :  { %v1474_v30 = vpop.permute.xlu0 %488 }
  0x9f   :  { %v504_v34 = vadd.f32 %v1300_v53, %v1474_v30  ;;  %v505_v51 = vadd.f32 %v1302_v54, %v1474_v30  ;;  %v503_v61 = vadd.f32 %v1304_v55, %v1474_v30  ;;  %v506_v47 = vadd.f32 %v1306_v56, %v1474_v30 }
  0xa0   :  { %v40_v62 = vpop.permute.xlu1 %39  ;;  %v1498_v53 = vrot.slane %v589_v16, %v1275_v25  ;;  %v1501_v54 = vrot.slane %v318_v10, %v1275_v25  ;;  %v537_v55 = vmul.f32 %v1387_v60, %v1413_v23  ;;  %v518_v56 = vmul.f32 %v1324_v5, %v1376_v38 }
  0xa1   :  { %v844_v42 = vcombine.high %v40_v62, %v40_v62  ;;  %v851_v24 = vrot.slane %v40_v62, %v1268_v18  ;;  %v524_v36 = vadd.f32 %v516_v29, %v504_v34  ;;  %v525_v62 = vadd.f32 %v517_v40, %v505_v51 }
  0xa2   :  { %v523_v43 = vadd.f32 %v515_v19, %v503_v61  ;;  %v646_v10 = vmul.f32 %v1422_v12, %v1498_v53  ;;  %v526_v31 = vadd.f32 %v518_v56, %v506_v47  ;;  %v647_v23 = vmul.f32 %v1422_v12, %v1508_v45 }
  0xa3   :  { %v858_v39 = vrot.slane %v844_v42, %v1268_v18  ;;  %v859_v20 = vcombine.high %v851_v24, %v851_v24  ;;  %v535_v34 = vmul.f32 %v1387_v60, %v1406_v13  ;;  %v645_v51 = vmul.f32 %v1422_v12, %v1451_v50 }
  0xa4   :  { %v1511_v16 = vpop.permute.xlu1 %934  ;;  %v1522_v61 = vrot.slane %v599_v1, %v1275_v25  ;;  %v1525_v11 = vrot.slane %v851_v24, %v1268_v18  ;;  %v538_v40 = vmul.f32 %v1387_v60, %v1432_v41  ;;  %v507_v19 = vadd.f32 %v1308_v57, %v1474_v30 }
  0xa5   :  { %1893 = vst [vmem:[#allocation32_spill] sm:$0xff] %v1511_v16  ;;  %v519_v47 = vmul.f32 %v1324_v5, %v1372_v44  ;;  %v544_v42 = vadd.f32 %v536_v0, %v524_v36  ;;  %v545_v29 = vadd.f32 %v537_v55, %v525_v62  ;;  %v543_v56 = vadd.f32 %v535_v34, %v523_v43 }
  0xa6   :  { %v648_v45 = vmul.f32 %v1422_v12, %v1522_v61  ;;  %v860_v1 = vcombine.high %v858_v39, %v858_v39  ;;  %v1536_v50 = vrot.slane %v858_v39, %v1268_v18  ;;  %v1539_v24 = vrot.slane %v859_v20, %v1268_v18 }
  0xa7   :  { %v546_v16 = vadd.f32 %v538_v40, %v526_v31  ;;  %v372_v57 = vmul.f32 %v1382_v48, %v1444_v59  ;;  %v369_v36 = vmul.f32 %v1382_v48, %v1416_v26  ;;  %v261_v43 = vmul.f32 %v1326_v6, %v1385_v49 }
  0xa8   :  { %v1541_v13 = vpop.permute.xlu1 %760  ;;  %v371_v0 = vmul.f32 %v1382_v48, %v1501_v54  ;;  %v527_v20 = vadd.f32 %v519_v47, %v507_v19  ;;  %v539_v31 = vmul.f32 %v1387_v60, %v1416_v26  ;;  %v1558_v55 = vrot.slane %v1419_v33, %v1275_v25 }
  0xa9   :  { %v1562_v6 = vadd.f32 %v646_v10, %v544_v42  ;;  %v1564_v34 = vadd.f32 %v647_v23, %v545_v29  ;;  %v1566_v48 = vadd.f32 %v645_v51, %v543_v56  ;;  %v1569_v40 = vrot.slane %v860_v1, %v1268_v18 }
  0xaa   :  { %v890_v19 = vcombine.high %v1536_v50, %v1536_v50  ;;  %v891_v47 = vcombine.high %v1539_v24, %v1539_v24  ;;  %v1575_v26 = vadd.f32 %v648_v45, %v546_v16 }
  0xac   :  { %v49_v39 = vpop.permute.xlu1 %48 }
  0xad   :  { %v153_v62 = vadd.f32 %v1338_v14, %v49_v39  ;;  %v154_v10 = vadd.f32 %v1340_v15, %v49_v39  ;;  %v155_v23 = vadd.f32 %v1342_v17, %v49_v39  ;;  %v158_v51 = vadd.f32 %v1345_v21, %v49_v39 }
  0xae   :  { %v156_v18 = vadd.f32 %v1347_v22, %v49_v39  ;;  %v160_v42 = vadd.f32 %v1350_v27, %v49_v39  ;;  %v157_v29 = vadd.f32 %v1352_v28, %v49_v39  ;;  %v159_v56 = vadd.f32 %v1358_v35, %v49_v39 }
  0xaf   :  { %v263_v1 = vadd.f32 %v1391_v63, %v153_v62  ;;  %v264_v45 = vadd.f32 %v1395_v3, %v154_v10  ;;  %v265_v14 = vadd.f32 %v1399_v4, %v155_v23  ;;  %v268_v15 = vadd.f32 %v1403_v9, %v158_v51  ;;  %v1894_v62 = vld [vmem:[#allocation27_spill] sm:$0xff] }
  0xb0   :  { %v266_v17 = vadd.f32 %v1429_v32, %v156_v18  ;;  %v270_v21 = vadd.f32 %v1478_v37, %v160_v42  ;;  %v662_v22 = vmax.f32 %v1562_v6, 0.0  ;;  %v663_v27 = vmax.f32 %v1564_v34, 0.0  ;;  %v1895_v34 = vld [vmem:[#allocation30_spill] sm:$0xff] }
  0xb1   :  { %v373_v28 = vadd.f32 %v1438_v46, %v263_v1  ;;  %v374_v35 = vadd.f32 %v1455_v8, %v264_v45  ;;  %v375_v63 = vadd.f32 %v1459_v7, %v265_v14  ;;  %v378_v3 = vadd.f32 %v1468_v2, %v268_v15  ;;  %v1896_v7 = vld [vmem:[#allocation19_spill] sm:$0xff]  ;;  %v1899_v45 = vld [vmem:[#allocation29_spill] sm:$0xff] }
  0xb2   :  { %v661_v4 = vmax.f32 %v1566_v48, 0.0  ;;  %v547_v9 = vadd.f32 %v539_v31, %v527_v20  ;;  %v649_v32 = vmul.f32 %v1422_v12, %v1558_v55  ;;  %v508_v37 = vadd.f32 %v1310_v58, %v1474_v30  ;;  %v1897_v48 = vld [vmem:[#allocation4_spill] sm:$0xff] }
  0xb3   :  { %v381_v16 = vmax.f32 %v373_v28, 0.0  ;;  %v382_v39 = vmax.f32 %v374_v35, 0.0  ;;  %v267_v6 = vadd.f32 %v1894_v62, %v157_v29  ;;  %v269_v46 = vadd.f32 %v261_v43, %v159_v56  ;;  %v1900_v28 = vld [vmem:[#allocation7_spill] sm:$0xff] }
  0xb4   :  { %v376_v8 = vadd.f32 %v1895_v34, %v266_v17  ;;  %v380_v10 = vadd.f32 %v372_v57, %v270_v21  ;;  %v520_v2 = vmul.f32 %v1324_v5, %v1896_v7  ;;  %v509_v20 = vadd.f32 %v1897_v48, %v1474_v30  ;;  %v1898_v57 = vld [vmem:[#allocation24_spill] sm:$0xff] }
  0xb5   :  { %v392_v31 = vsel %vm391_vm0, %v381_v16, 0.0  ;;  %v393_v58 = vsel %vm391_vm0, %v382_v39, 0.0  ;;  %v383_v23 = vmax.f32 %v375_v63, 0.0  ;;  %v386_v51 = vmax.f32 %v378_v3, 0.0  ;;  %v1901_v63 = vld [vmem:[#allocation17_spill] sm:$0xff]  ;;  %v1902_v3 = vld [vmem:[#allocation6_spill] sm:$0xff] }
  0xb6   :  { %400 = vmax.xlane.f32.xlu0 %v392_v31  ;;  %402 = vmax.xlane.f32.xlu1 %v393_v58  ;;  %v664_v43 = vmax.f32 %v1575_v26, 0.0  ;;  %v528_v18 = vadd.f32 %v520_v2, %v508_v37  ;;  %v540_v42 = vmul.f32 %v1387_v60, %v1898_v57  ;;  %v521_v29 = vmul.f32 %v1324_v5, %v1385_v49  ;;  %v1905_v31 = vld [vmem:[#allocation15_spill] sm:$0xff] }
  0xb7   :  { %v377_v56 = vadd.f32 %v369_v36, %v267_v6  ;;  %v379_v1 = vadd.f32 %v371_v0, %v269_v46  ;;  %v1620_v14 = vrot.slane %v1899_v45, %v1275_v25  ;;  %v541_v15 = vmul.f32 %v1387_v60, %v1501_v54 }
  0xb8   :  { %v384_v17 = vmax.f32 %v376_v8, 0.0  ;;  %v529_v21 = vadd.f32 %v521_v29, %v509_v20  ;;  %v776_v35 = vadd.f32 %v1900_v28, %v1541_v13  ;;  %v788_v37 = vmul.f32 %v1902_v3, %v1901_v63  ;;  %v1909_v63 = vld [vmem:[#allocation26_spill] sm:$0xff] }
  0xb9   :  { %v394_v16 = vsel %vm391_vm0, %v383_v23, 0.0  ;;  %v397_v36 = vsel %vm391_vm0, %v386_v51, 0.0  ;;  %v388_v0 = vmax.f32 %v380_v10, 0.0  ;;  %v1903_v39 = vcombine.high %v1419_v33, %v1419_v33  ;;  %v1904_v10 = vld [vmem:[#allocation21_spill] sm:$0xff] }
  0xba   :  { %404 = vmax.xlane.f32.xlu0 %v394_v16  ;;  %410 = vmax.xlane.f32.xlu1 %v397_v36  ;;  %v671_v6 = vsel %vm669_vm1, %v662_v22, 0.0  ;;  %v548_v46 = vadd.f32 %v540_v42, %v528_v18  ;;  %v650_v34 = vmul.f32 %v1422_v12, %v1620_v14  ;;  %v796_v8 = vadd.f32 %v788_v37, %v776_v35  ;;  %v1906_v22 = vld [vmem:[#allocation8_spill] sm:$0xff]  ;;  %v1910_v36 = vld [vmem:[#allocation9_spill] sm:$0xff] }
  0xbb   :  { %v1636_v62 = vrot.slane %v1903_v39, %v1275_v25  ;;  %v385_v2 = vmax.f32 %v377_v56, 0.0  ;;  %v387_v48 = vmax.f32 %v379_v1, 0.0  ;;  %v657_v20 = vadd.f32 %v649_v32, %v547_v9  ;;  %v1907_v56 = vld [vmem:[#allocation5_spill] sm:$0xff] }
  0xbc   :  { %v808_v58 = vmul.f32 %v1905_v31, %v1904_v10  ;;  %v395_v33 = vsel %vm391_vm0, %v384_v17, 0.0  ;;  %v549_v23 = vadd.f32 %v541_v15, %v529_v21  ;;  %v778_v18 = vadd.f32 %v1906_v22, %v1541_v13  ;;  %v1908_v21 = vld [vmem:[#allocation25_spill] sm:$0xff] }
  0xbd   :  { %v651_v51 = vmul.f32 %v1422_v12, %v1636_v62  ;;  %v399_v42 = vsel %vm391_vm0, %v388_v0, 0.0  ;;  %v510_v9 = vadd.f32 %v1907_v56, %v1474_v30  ;;  %v790_v32 = vmul.f32 %v1902_v3, %v1376_v38 }
  0xbe   :  { %v816_v29 = vadd.f32 %v808_v58, %v796_v8  ;;  %406 = vmax.xlane.f32.xlu0 %v395_v33  ;;  %414 = vmax.xlane.f32.xlu1 %v399_v42  ;;  %v672_v1 = vsel %vm669_vm1, %v663_v27, 0.0  ;;  %v670_v15 = vsel %vm669_vm1, %v661_v4, 0.0  ;;  %v658_v17 = vadd.f32 %v650_v34, %v548_v46 }
  0xbf   :  { %v828_v28 = vmul.f32 %v1908_v21, %v1498_v53  ;;  %v900_v35 = vrot.slane %v1539_v24, %v1275_v25  ;;  %v522_v30 = vmul.f32 %v1324_v5, %v1909_v63  ;;  %v600_v38 = vcombine.high %v1899_v45, %v1899_v45 }
  0xc0   :  { %v798_v37 = vadd.f32 %v790_v32, %v778_v18  ;;  %v396_v27 = vsel %vm391_vm0, %v385_v2, 0.0  ;;  %v659_v16 = vadd.f32 %v651_v51, %v549_v23  ;;  %v810_v4 = vmul.f32 %v1905_v31, %v1432_v41  ;;  %v1911_v2 = vld [vmem:[#allocation16_spill] sm:$0xff] }
  0xc1   :  { %v775_v53 = vadd.f32 %v1910_v36, %v1541_v13  ;;  %v398_v0 = vsel %vm391_vm0, %v387_v48, 0.0  ;;  %v665_v39 = vmax.f32 %v657_v20, 0.0  ;;  %v836_v46 = vadd.f32 %v828_v28, %v816_v29  ;;  %v1912_v41 = vld [vmem:[#allocation32_spill] sm:$0xff]  ;;  %v1913_v48 = vld [vmem:[#allocation10_spill] sm:$0xff] }
  0xc2   :  { %v530_v5 = vadd.f32 %v522_v30, %v510_v9  ;;  %408 = vmax.xlane.f32.xlu0 %v396_v27  ;;  %680 = vmax.xlane.f32.xlu1 %v671_v6  ;;  %v666_v45 = vmax.f32 %v658_v17, 0.0  ;;  %v542_v34 = vmul.f32 %v1387_v60, %v1444_v59  ;;  %v818_v8 = vadd.f32 %v810_v4, %v798_v37  ;;  %v1914_v9 = vld [vmem:[#allocation20_spill] sm:$0xff]  ;;  %v1916_v17 = vld [vmem:[#allocation18_spill] sm:$0xff] }
  0xc3   :  { %v787_v10 = vmul.f32 %v1902_v3, %v1911_v2  ;;  %v938_v58 = vmul.f32 %v1912_v41, %v900_v35  ;;  %v1682_v33 = vrot.slane %v600_v38, %v1275_v25  ;;  %v780_v20 = vadd.f32 %v1913_v48, %v1541_v13  ;;  %v1917_v38 = vld [vmem:[#allocation12_spill] sm:$0xff] }
  0xc4   :  { %v792_v23 = vmul.f32 %v1902_v3, %v1896_v7  ;;  %v667_v6 = vmax.f32 %v659_v16, 0.0  ;;  %v830_v51 = vmul.f32 %v1908_v21, %v1522_v61  ;;  %v908_v60 = vrot.slane %v891_v47, %v1275_v25  ;;  %v1915_v47 = vld [vmem:[#allocation11_spill] sm:$0xff] }
  0xc5   :  { %v795_v22 = vadd.f32 %v787_v10, %v775_v53  ;;  %v946_v18 = vadd.f32 %v938_v58, %v836_v46  ;;  %v550_v42 = vadd.f32 %v542_v34, %v530_v5  ;;  %v652_v29 = vmul.f32 %v1422_v12, %v1682_v33  ;;  %v1921_v58 = vld [vmem:[#allocation13_spill] sm:$0xff] }
  0xc6   :  { %v800_v56 = vadd.f32 %v792_v23, %v780_v20  ;;  %412 = vmax.xlane.f32.xlu0 %v398_v0  ;;  %682 = vmax.xlane.f32.xlu1 %v672_v1  ;;  %v673_v7 = vsel %vm669_vm1, %v664_v43, 0.0  ;;  %v838_v61 = vadd.f32 %v830_v51, %v818_v8  ;;  %v807_v24 = vmul.f32 %v1905_v31, %v1914_v9  ;;  %v1918_v0 = vld [vmem:[#allocation28_spill] sm:$0xff] }
  0xc7   :  { %v777_v32 = vadd.f32 %v1915_v47, %v1541_v13  ;;  %v674_v12 = vsel %vm669_vm1, %v665_v39, 0.0  ;;  %v675_v1 = vsel %vm669_vm1, %v666_v45, 0.0  ;;  %v812_v26 = vmul.f32 %v1905_v31, %v1898_v57  ;;  %v1919_v45 = vld [vmem:[#allocation22_spill] sm:$0xff] }
  0xc8   :  { %v789_v43 = vmul.f32 %v1902_v3, %v1916_v17  ;;  %v676_v28 = vsel %vm669_vm1, %v667_v6, 0.0  ;;  %v940_v35 = vmul.f32 %v1912_v41, %v908_v60  ;;  %v815_v30 = vadd.f32 %v807_v24, %v795_v22  ;;  %v1925_v47 = vld [vmem:[#allocation14_spill] sm:$0xff] }
  0xc9   :  { %v781_v37 = vadd.f32 %v1917_v38, %v1541_v13  ;;  %v660_v27 = vadd.f32 %v652_v29, %v550_v42  ;;  %v820_v16 = vadd.f32 %v812_v26, %v800_v56  ;;  %v793_v36 = vmul.f32 %v1902_v3, %v1385_v49  ;;  %v1923_v42 = vld [vmem:[#allocation23_spill] sm:$0xff] }
  0xca   :  { %v797_v4 = vadd.f32 %v789_v43, %v777_v32  ;;  %678 = vmax.xlane.f32.xlu0 %v670_v15  ;;  %684 = vmax.xlane.f32.xlu1 %v673_v7  ;;  %v954_v57 = vmax.f32 %v946_v18, 0.0  ;;  %v948_v53 = vadd.f32 %v940_v35, %v838_v61  ;;  %v827_v39 = vmul.f32 %v1908_v21, %v1918_v0  ;;  %v1924_v7 = vld [vmem:[#allocation31_spill] sm:$0xff] }
  0xcb   :  { %v832_v46 = vmul.f32 %v1908_v21, %v1620_v14  ;;  %v916_v5 = vrot.slane %v1569_v40, %v1275_v25  ;;  %v809_v34 = vmul.f32 %v1905_v31, %v1919_v45  ;;  %v801_v8 = vadd.f32 %v793_v36, %v781_v37 }
  0xcc   :  { %v813_v49 = vmul.f32 %v1905_v31, %v1501_v54  ;;  %v835_v15 = vadd.f32 %v827_v39, %v815_v30  ;;  %v1920_v2 = vrot.slane %v1525_v11, %v1275_v25  ;;  %v779_v48 = vadd.f32 %v1921_v58, %v1541_v13 }
  0xcd   :  { %v791_v14 = vmul.f32 %v1902_v3, %v1372_v44  ;;  %v668_v20 = vmax.f32 %v660_v27, 0.0  ;;  %v840_v23 = vadd.f32 %v832_v46, %v820_v16  ;;  %v817_v6 = vadd.f32 %v809_v34, %v797_v4 }
  0xce   :  { %v937_v10 = vmul.f32 %v1912_v41, %v1920_v2  ;;  %v821_v51 = vadd.f32 %v813_v49, %v801_v8  ;;  %686 = vmax.xlane.f32.xlu0 %v674_v12  ;;  %688 = vmax.xlane.f32.xlu1 %v675_v1  ;;  %v956_v60 = vmax.f32 %v948_v53, 0.0  ;;  %v1922_v54 = vcombine.high %v1525_v11, %v1525_v11  ;;  %v1047_v2 = vld [vmem:[%s1839_s7 + $0x8] sm:$0xff] }
  0xcf   :  { %v799_v18 = vadd.f32 %v791_v14, %v779_v48  ;;  %v811_v29 = vmul.f32 %v1905_v31, %v1923_v42  ;;  %v942_v56 = vmul.f32 %v1912_v41, %v916_v5  ;;  %v829_v44 = vmul.f32 %v1908_v21, %v1924_v7  ;;  %v1048_v48 = vld [vmem:[%s1839_s7 + $0x10] sm:$0xff] }
  0xd0   :  { %v904_v22 = vrot.slane %v1922_v54, %v1275_v25  ;;  %v833_v61 = vmul.f32 %v1908_v21, %v1636_v62  ;;  %v920_v9 = vrot.slane %v890_v19, %v1275_v25  ;;  %v945_v24 = vadd.f32 %v937_v10, %v835_v15  ;;  %v1046_v15 = vld [vmem:[%s1839_s7] sm:$0xff] }
  0xd1   :  { %v819_v11 = vadd.f32 %v811_v29, %v799_v18  ;;  %v782_v32 = vadd.f32 %v1925_v47, %v1541_v13  ;;  %v794_v12 = vmul.f32 %v1902_v3, %v1909_v63  ;;  %v963_v1 = vsel %vm961_vm2, %v954_v57, 0.0 }
  0xd2   :  { %v950_v26 = vadd.f32 %v942_v56, %v840_v23  ;;  %v837_v17 = vadd.f32 %v829_v44, %v817_v6  ;;  %v841_v43 = vadd.f32 %v833_v61, %v821_v51  ;;  %690 = vmax.xlane.f32.xlu0 %v676_v28  ;;  %972 = vmax.xlane.f32.xlu1 %v963_v1  ;;  %v677_v62 = vsel %vm669_vm1, %v668_v20, 0.0  ;;  %v1926_v51 = vld [vmem:[#allocation3_spill] sm:$0xff] }
  0xd3   :  { %v939_v19 = vmul.f32 %v1912_v41, %v904_v22  ;;  %v802_v35 = vadd.f32 %v794_v12, %v782_v32  ;;  %v814_v13 = vmul.f32 %v1905_v31, %v1444_v59  ;;  %v943_v30 = vmul.f32 %v1912_v41, %v920_v9 }
  0xd4   :  { %v831_v3 = vmul.f32 %v1908_v21, %v1558_v55  ;;  %v912_v63 = vrot.slane %v1536_v50, %v1275_v25  ;;  %v892_v28 = vcombine.high %v1569_v40, %v1569_v40  ;;  %v965_v38 = vsel %vm961_vm2, %v956_v60, 0.0 }
  0xd5   :  { %v953_v37 = vmax.f32 %v945_v24, 0.0  ;;  %v822_v27 = vadd.f32 %v814_v13, %v802_v35  ;;  %v834_v16 = vmul.f32 %v1908_v21, %v1682_v33  ;;  %v958_v59 = vmax.f32 %v950_v26, 0.0 }
  0xd6   :  { %v947_v31 = vadd.f32 %v939_v19, %v837_v17  ;;  %v951_v4 = vadd.f32 %v943_v30, %v841_v43  ;;  %v839_v36 = vadd.f32 %v831_v3, %v819_v11  ;;  %692 = vmax.xlane.f32.xlu0 %v677_v62  ;;  %976 = vmax.xlane.f32.xlu1 %v965_v38  ;;  %v1193_v10 = vmov 0.0  }
  0xd7   :  { %v842_v55 = vadd.f32 %v834_v16, %v822_v27  ;;  %v941_v50 = vmul.f32 %v1912_v41, %v912_v63  ;;  %v924_v57 = vrot.slane %v892_v28, %v1275_v25  ;;  %v962_v40 = vsel %vm961_vm2, %v953_v37, 0.0  ;;  %1151 = vmatprep.mubr.msk.f32.mxu0 %vm1192_vm3, %v1193_v10 }
  0xd8   :  { %v967_v53 = vsel %vm961_vm2, %v958_v59, 0.0  ;;  %v955_v0 = vmax.f32 %v947_v31, 0.0  ;;  %v959_v39 = vmax.f32 %v951_v4, 0.0  ;;  %v1155_v58 = vpack.c.bf16 %v1047_v2, %v1046_v15 }
  0xd9   :  { %v949_v21 = vadd.f32 %v941_v50, %v839_v36  ;;  %v944_v33 = vmul.f32 %v1912_v41, %v924_v57  ;;  %v1191_v41 = vmov 0.0|0.0   ;;  %v434_v60 = vsub.s32 %v1298_v52, %v1926_v51 }
  0xda   :  { %970 = vmax.xlane.f32.xlu0 %v962_v40  ;;  %980 = vmax.xlane.f32.xlu1 %v967_v53  ;;  %v964_v46 = vsel %vm961_vm2, %v955_v0, 0.0  ;;  %v968_v5 = vsel %vm961_vm2, %v959_v39, 0.0  ;;  %v710_v17 = vadd.s32 4294967288, %v1298_v52 }
  0xdb   :  { %v957_v25 = vmax.f32 %v949_v21, 0.0  ;;  %v952_v45 = vadd.f32 %v944_v33, %v842_v55  ;;  %1154 = vmatprep.subr.bf16.mxu0 %v1191_v41 }
  0xdc   :  { %1156 = vmatpush3.bf16.msra.mxu0 %v1155_v58  ;;  %v713_v63 = vsub.s32 %v710_v17, %v1926_v51 }
  0xdd   :  { %v966_v34 = vsel %vm961_vm2, %v957_v25, 0.0  ;;  %v960_v8 = vmax.f32 %v952_v45, 0.0  ;;  %1149 = vmatprep.subr.mxu0 %v1193_v10 }
  0xde   :  { %974 = vmax.xlane.f32.xlu0 %v964_v46  ;;  %982 = vmax.xlane.f32.xlu1 %v968_v5 }
  0xdf   :  { %v969_v49 = vsel %vm961_vm2, %v960_v8, 0.0 }
  0xe0   :  { %1150 = vmatpush3.msra.mxu0 %v1048_v48 }
  0xe2   :  { %978 = vmax.xlane.f32.xlu0 %v966_v34 }
  0xe6   :  { %984 = vmax.xlane.f32.xlu0 %v969_v49 }
 0x143   :  { %v401_v14 = vpop.xlane.xlu0 %400  ;;  %v403_v20 = vpop.xlane.xlu1 %402 }
 0x144   :  { %v416_v54 = vmax.f32 %v401_v14, 0.0  ;;  %v417_v22 = vmax.f32 %v403_v20, 0.0  ;;  %v1002_v20 = vadd.s32 4294967280, %v1298_v52 }
 0x146   :  { %v435_v7 = vrot.slane %v416_v54, %v434_v60  ;;  %v439_v44 = vrot.slane %v417_v22, %v434_v60 }
 0x147   :  { %v405_v23 = vpop.xlane.xlu0 %404  ;;  %v411_v6 = vpop.xlane.xlu1 %410 }
 0x148   :  { %v418_v18 = vmax.f32 %v405_v23, 0.0  ;;  %v465_v32 = vsel %vm464_vm4, %v439_v44, %v435_v7  ;;  %v421_v12 = vmax.f32 %v411_v6, 0.0 }
 0x14a   :  { %v443_v61 = vrot.slane %v418_v18, %v434_v60  ;;  %v455_v3 = vrot.slane %v421_v12, %v434_v60 }
 0x14b   :  { %v407_v42 = vpop.xlane.xlu0 %406  ;;  %v415_v29 = vpop.xlane.xlu1 %414 }
 0x14c   :  { %v419_v56 = vmax.f32 %v407_v42, 0.0  ;;  %v467_v1 = vsel %vm466_vm5, %v443_v61, %v465_v32  ;;  %v423_v62 = vmax.f32 %v415_v29, 0.0  ;;  %v1005_v29 = vsub.s32 %v1002_v20, %v1926_v51 }
 0x14e   :  { %v447_v9 = vrot.slane %v419_v56, %v434_v60  ;;  %v463_v37 = vrot.slane %v423_v62, %v434_v60 }
 0x14f   :  { %v409_v24 = vpop.xlane.xlu0 %408  ;;  %v681_v11 = vpop.xlane.xlu1 %680 }
 0x150   :  { %v420_v47 = vmax.f32 %v409_v24, 0.0  ;;  %v469_v43 = vsel %vm468_vm6, %v447_v9, %v467_v1  ;;  %v695_v28 = vmax.f32 %v681_v11, 0.0 }
 0x152   :  { %v451_v26 = vrot.slane %v420_v47, %v434_v60  ;;  %v718_v50 = vrot.slane %v695_v28, %v713_v63 }
 0x153   :  { %v413_v19 = vpop.xlane.xlu0 %412  ;;  %v683_v35 = vpop.xlane.xlu1 %682 }
 0x154   :  { %v471_v13 = vsel %vm470_vm7, %v451_v26, %v469_v43  ;;  %v422_v30 = vmax.f32 %v413_v19, 0.0  ;;  %v696_v16 = vmax.f32 %v683_v35, 0.0 }
 0x155   :  { %v473_v27 = vsel %vm472_vm8, %v455_v3, %v471_v13 }
 0x156   :  { %v459_v38 = vrot.slane %v422_v30, %v434_v60  ;;  %v722_v53 = vrot.slane %v696_v16, %v713_v63  ;;  %v1139_v16 = vld [vmem:[%s1840_s8] ss:$0 sm:$0xff] }
 0x157   :  { %v679_v59 = vpop.xlane.xlu0 %678  ;;  %v685_v31 = vpop.xlane.xlu1 %684 }
 0x158   :  { %v475_v4 = vsel %vm474_vm9, %v459_v38, %v473_v27  ;;  %v694_v36 = vmax.f32 %v679_v59, 0.0  ;;  %v697_v40 = vmax.f32 %v685_v31, 0.0 }
 0x159   :  { %v477_v55 = vsel %vm476_vm10, %v463_v37, %v475_v4 }
 0x15a   :  { %v714_v57 = vrot.slane %v694_v36, %v713_v63  ;;  %480 = vst.msk [vmem:[#allocation2] sm:$0xff] %vm479_vm11, %v477_v55  ;;  %v726_v5 = vrot.slane %v697_v40, %v713_v63 }
 0x15b   :  { %v687_v0 = vpop.xlane.xlu0 %686  ;;  %v689_v39 = vpop.xlane.xlu1 %688 }
 0x15c   :  { %v743_v21 = vsel %vm464_vm4, %v718_v50, %v714_v57  ;;  %v698_v33 = vmax.f32 %v687_v0, 0.0  ;;  %v699_v25 = vmax.f32 %v689_v39, 0.0 }
 0x15d   :  { %v744_v46 = vsel %vm466_vm5, %v722_v53, %v743_v21 }
 0x15e   :  { %v730_v45 = vrot.slane %v698_v33, %v713_v63  ;;  %v745_v49 = vsel %vm468_vm6, %v726_v5, %v744_v46  ;;  %v734_v15 = vrot.slane %v699_v25, %v713_v63 }
 0x15f   :  { %v691_v34 = vpop.xlane.xlu0 %690  ;;  %v973_v8 = vpop.xlane.xlu1 %972 }
 0x160   :  { %v700_v41 = vmax.f32 %v691_v34, 0.0  ;;  %v746_v2 = vsel %vm470_vm7, %v730_v45, %v745_v49  ;;  %v987_v56 = vmax.f32 %v973_v8, 0.0 }
 0x161   :  { %v747_v23 = vsel %vm472_vm8, %v734_v15, %v746_v2 }
 0x162   :  { %v738_v10 = vrot.slane %v700_v41, %v713_v63  ;;  %v1010_v9 = vrot.slane %v987_v56, %v1005_v29 }
 0x163   :  { %v693_v58 = vpop.xlane.xlu0 %692  ;;  %v977_v48 = vpop.xlane.xlu1 %976 }
 0x164   :  { %v701_v14 = vmax.f32 %v693_v58, 0.0  ;;  %v748_v60 = vsel %vm474_vm9, %v738_v10, %v747_v23  ;;  %v989_v52 = vmax.f32 %v977_v48, 0.0 }
 0x166   :  { %v742_v6 = vrot.slane %v701_v14, %v713_v63  ;;  %v1018_v43 = vrot.slane %v989_v52, %v1005_v29 }
 0x167   :  { %v971_v54 = vpop.xlane.xlu0 %970  ;;  %v981_v22 = vpop.xlane.xlu1 %980 }
 0x168   :  { %v749_v18 = vsel %vm476_vm10, %v742_v6, %v748_v60  ;;  %v986_v42 = vmax.f32 %v971_v54, 0.0  ;;  %v991_v32 = vmax.f32 %v981_v22, 0.0 }
 0x169   :  { %752 = vst.msk [vmem:[#allocation2] sm:$0xff] %vm751_vm12, %v749_v18 }
 0x16a   :  { %v1006_v7 = vrot.slane %v986_v42, %v1005_v29  ;;  %v1026_v51 = vrot.slane %v991_v32, %v1005_v29 }
 0x16b   :  { %v975_v44 = vpop.xlane.xlu0 %974  ;;  %v983_v24 = vpop.xlane.xlu1 %982 }
 0x16c   :  { %v988_v61 = vmax.f32 %v975_v44, 0.0  ;;  %v1035_v47 = vsel %vm464_vm4, %v1010_v9, %v1006_v7  ;;  %v992_v26 = vmax.f32 %v983_v24, 0.0 }
 0x16e   :  { %v1014_v11 = vrot.slane %v988_v61, %v1005_v29  ;;  %v1030_v13 = vrot.slane %v992_v26, %v1005_v29 }
 0x16f   :  { %v979_v12 = vpop.xlane.xlu0 %978 }
 0x170   :  { %v1036_v1 = vsel %vm466_vm5, %v1014_v11, %v1035_v47  ;;  %v990_v17 = vmax.f32 %v979_v12, 0.0 }
 0x171   :  { %v1037_v19 = vsel %vm468_vm6, %v1018_v43, %v1036_v1 }
 0x172   :  { %v1022_v62 = vrot.slane %v990_v17, %v1005_v29 }
 0x173   :  { %v985_v35 = vpop.xlane.xlu0 %984 }
 0x174   :  { %v1038_v30 = vsel %vm470_vm7, %v1022_v62, %v1037_v19  ;;  %v993_v3 = vmax.f32 %v985_v35, 0.0 }
 0x175   :  { %v1039_v63 = vsel %vm472_vm8, %v1026_v51, %v1038_v30 }
 0x176   :  { %v1034_v28 = vrot.slane %v993_v3, %v1005_v29  ;;  %v1040_v38 = vsel %vm474_vm9, %v1030_v13, %v1039_v63 }
 0x178   :  { %v1041_v37 = vsel %vm476_vm10, %v1034_v28, %v1040_v38 }
 0x179   :  { %1044 = vst.msk [vmem:[#allocation2] sm:$0xff] %vm1043_vm13, %v1041_v37 }
 0x180   :  { %v1045_v27 = vld [vmem:[#allocation2] sm:$0xff] }
 0x181   :  { %1152 = vmatmul.mubr.msk.f32.vlgmr.msra.gmra.mrb[0].mxu0 %vm1056_vm14, %v1045_v27 }
 0x254   :  { %v1126_v59 = vpop.f32.mrb[0].mxu0 }
 0x255   :  { %v1127_v31 = vadd.f32 %v1139_v16, %v1126_v59  ;;  %v1153_v4 = vpop.f32.mrb[1].mxu0 }
 0x257   :  { %1131 = vst.msk [vmem:[%s1841_s9] sm:$0xff] %vm1130_vm15, %v1127_v31 }

</bundles_post_ra>
